<compile_context>
chip_gen: v5e
topology: v5e:2x2
jax: 0.10.0
libtpu: 0.0.40
codegen_flags: <defaults>
</compile_context>

<pallas_src>
import jax
import jax.numpy as jnp
from jax import lax
from jax.experimental import pallas as pl
from jax.experimental.pallas import tpu as pltpu

EPS = 1e-5


def _conv_stats_kernel(w_ref, p_ref, y_ref, ssum_ref, ssq_ref):
    # w_ref:    (Cout, K)        K = Cin*KH*KW  (all taps fused -> single MXU call)
    # p_ref:    (1, K, HW)       im2col patches for one batch element (HW lane-dense)
    # y_ref:    (1, Cout, HW)    conv output (lane-dense, already NCHW-flattened)
    # ssum_ref: (1, Cout, 1)     per-batch per-channel sum        (BN partial stats)
    # ssq_ref:  (1, Cout, 1)     per-batch per-channel sum of x^2 (BN partial stats)
    y = jnp.dot(w_ref[...], p_ref[0], preferred_element_type=jnp.float32)  # (Cout, HW)
    y_ref[0] = y
    ssum_ref[0] = jnp.sum(y, axis=-1, keepdims=True)        # lane reduce (XLU)
    ssq_ref[0] = jnp.sum(y * y, axis=-1, keepdims=True)


def _affine_kernel(scale_ref, shift_ref, y_ref, o_ref):
    # scale/shift: (1, Cout, 1); y/o: (1, Cout, hw_blk) -- streamed elementwise epilogue
    o_ref[...] = y_ref[...] * scale_ref[...] + shift_ref[...]


def basic_conv2d(x_nchw, weight_oihw, gamma, beta, *, stride=1, padding=1, dilation=1):
    # TODO(synk): stride>1 / dilation>1 are accepted by the PyTorch module signature but
    # not implemented here; guard so a mis-configured call fails loudly instead of
    # silently returning wrong results.
    assert stride == 1 and dilation == 1, "only stride=1, dilation=1 implemented"

    N, Cin, H, W = x_nchw.shape
    Cout, _, KH, KW = weight_oihw.shape
    Ho = H + 2 * padding - KH + 1
    Wo = W + 2 * padding - KW + 1
    HW = Ho * Wo
    K = Cin * KH * KW

    # ---- glue: pad + im2col (layout plumbing so the kernel is one lane-dense GEMM) ----
    x = x_nchw.astype(jnp.float32)
    x_pad = jnp.pad(x, ((0, 0), (0, 0), (padding, padding), (padding, padding)))
    taps = [x_pad[:, :, kh:kh + Ho, kw:kw + Wo].reshape(N, Cin, 1, HW)
            for kh in range(KH) for kw in range(KW)]
    patches = jnp.concatenate(taps, axis=2).reshape(N, K, HW)      # K order = (cin, kh, kw)
    w2d = weight_oihw.astype(jnp.float32).reshape(Cout, K)         # same (cin, kh, kw) order

    # ---- pass 1: conv (single K-fused matmul per batch) + BN partial stats ----
    conv_y, ssum, ssq = pl.pallas_call(
        _conv_stats_kernel,
        out_shape=(
            jax.ShapeDtypeStruct((N, Cout, HW), jnp.float32),
            jax.ShapeDtypeStruct((N, Cout, 1), jnp.float32),
            jax.ShapeDtypeStruct((N, Cout, 1), jnp.float32),
        ),
        grid=(N,),
        in_specs=[
            pl.BlockSpec((Cout, K), lambda n: (0, 0)),
            pl.BlockSpec((1, K, HW), lambda n: (n, 0, 0)),
        ],
        out_specs=(
            pl.BlockSpec((1, Cout, HW), lambda n: (n, 0, 0)),
            pl.BlockSpec((1, Cout, 1), lambda n: (n, 0, 0)),
            pl.BlockSpec((1, Cout, 1), lambda n: (n, 0, 0)),
        ),
        compiler_params=pltpu.CompilerParams(dimension_semantics=("parallel",)),
    )(w2d, patches)

    # ---- finalize BN statistics (tiny: 2*Cout scalars) and fold into scale/shift ----
    cnt = jnp.float32(N * HW)
    mean = jnp.sum(ssum, axis=0) / cnt                    # (Cout, 1)
    var = jnp.sum(ssq, axis=0) / cnt - mean * mean        # biased variance (training BN)
    inv = lax.rsqrt(var + EPS)
    scale = gamma.astype(jnp.float32).reshape(Cout, 1) * inv
    shift = beta.astype(jnp.float32).reshape(Cout, 1) - mean * scale
    scale3 = scale.reshape(1, Cout, 1)
    shift3 = shift.reshape(1, Cout, 1)

    # ---- pass 2: tiled, pipelined affine epilogue (lane-dense blocks) ----
    hw_blk = HW
    for cand in (2048, 1024, 512, 256, 128):
        if HW % cand == 0:
            hw_blk = cand
            break
    n_hw = HW // hw_blk

    bn_y = pl.pallas_call(
        _affine_kernel,
        out_shape=jax.ShapeDtypeStruct((N, Cout, HW), jnp.float32),
        grid=(N, n_hw),
        in_specs=[
            pl.BlockSpec((1, Cout, 1), lambda n, h: (0, 0, 0)),
            pl.BlockSpec((1, Cout, 1), lambda n, h: (0, 0, 0)),
            pl.BlockSpec((1, Cout, hw_blk), lambda n, h: (n, 0, h)),
        ],
        out_specs=pl.BlockSpec((1, Cout, hw_blk), lambda n, h: (n, 0, h)),
        compiler_params=pltpu.CompilerParams(
            dimension_semantics=("parallel", "parallel")),
    )(scale3, shift3, conv_y)

    # internal layout is already (N, Cout, HW) == flattened NCHW: just reshape
    return bn_y.reshape(N, Cout, Ho, Wo)


def _reference(x_nchw, weight_oihw, gamma, beta, *, padding=1):
    y = lax.conv_general_dilated(
        x_nchw, weight_oihw, window_strides=(1, 1),
        padding=((padding, padding), (padding, padding)),
        dimension_numbers=("NCHW", "OIHW", "NCHW"))
    mean = jnp.mean(y, axis=(0, 2, 3), keepdims=True)
    var = jnp.mean((y - mean) ** 2, axis=(0, 2, 3), keepdims=True)
    g = gamma.reshape(1, -1, 1, 1)
    b = beta.reshape(1, -1, 1, 1)
    return (y - mean) * lax.rsqrt(var + EPS) * g + b


if __name__ == "__main__":
    # BasicConv2d(in_planes=4, out_planes=8, kernel_size=3, padding=1)
    N, Cin, H, W = 2, 4, 16, 16
    Cout, KH, KW = 8, 3, 3

    key = jax.random.PRNGKey(0)
    kx, kw, kg, kb = jax.random.split(key, 4)
    x = jax.random.normal(kx, (N, Cin, H, W), jnp.float32)
    weight = jax.random.normal(kw, (Cout, Cin, KH, KW), jnp.float32) * 0.1
    gamma = 1.0 + 0.1 * jax.random.normal(kg, (Cout,), jnp.float32)
    beta = 0.1 * jax.random.normal(kb, (Cout,), jnp.float32)

    out = basic_conv2d(x, weight, gamma, beta, padding=1)
    out = jax.block_until_ready(out)

    ref = _reference(x, weight, gamma, beta, padding=1)
    assert out.shape == (N, Cout, H, W), out.shape
    assert jnp.allclose(out, ref, rtol=1e-4, atol=1e-4), \
        float(jnp.max(jnp.abs(out - ref)))

    print("KERNEL_OK")
</pallas_src>

<mosaic_0001>
module attributes {stable_mosaic.version = 11 : i64} {
  func.func @_conv_stats_kernel(%arg0: i32, %arg1: memref<8x36xf32, #tpu.memory_space<vmem>>, %arg2: memref<1x36x256xf32, #tpu.memory_space<vmem>>, %arg3: memref<1x8x256xf32, #tpu.memory_space<vmem>>, %arg4: memref<1x8x1xf32, #tpu.memory_space<vmem>>, %arg5: memref<1x8x1xf32, #tpu.memory_space<vmem>>) attributes {dimension_semantics = [#tpu.dimension_semantics<parallel>], iteration_bounds = array<i64: 2>, scalar_prefetch = 0 : i64, scratch_operands = 0 : i64, tpu.core_type = #tpu.core_type<tc>, window_params = [{pipeline_mode = #tpu.pipeline_mode<synchronous>, transform_indices = @transform_0, window_bounds = array<i64: 8, 36>}, {transform_indices = @transform_1, window_bounds = array<i64: 1, 36, 256>}, {transform_indices = @transform_2, window_bounds = array<i64: 1, 8, 256>}, {transform_indices = @transform_3, window_bounds = array<i64: 1, 8, 1>}, {transform_indices = @transform_4, window_bounds = array<i64: 1, 8, 1>}]} {
    %c0 = arith.constant 0 : index
    %c0_0 = arith.constant 0 : index
    %0 = vector.load %arg1[%c0, %c0_0] : memref<8x36xf32, #tpu.memory_space<vmem>>, vector<8x36xf32>
    %c0_1 = arith.constant 0 : index
    %c0_2 = arith.constant 0 : index
    %c0_3 = arith.constant 0 : index
    %1 = vector.load %arg2[%c0_1, %c0_2, %c0_3] : memref<1x36x256xf32, #tpu.memory_space<vmem>>, vector<1x36x256xf32>
    %2 = vector.shape_cast %1 : vector<1x36x256xf32> to vector<36x256xf32>
    %cst = arith.constant dense<0.000000e+00> : vector<8x256xf32>
    %3 = tpu.matmul %0, %2, %cst {dimension_numbers = #tpu.dot_dimension_numbers<[1], [0], [0], [1], [0, 0, 1, 1], [], []>} : vector<8x36xf32>, vector<36x256xf32>, vector<8x256xf32> -> vector<8x256xf32>
    %c0_4 = arith.constant 0 : index
    %c0_5 = arith.constant 0 : index
    %c0_6 = arith.constant 0 : index
    %4 = vector.load %arg3[%c0_4, %c0_5, %c0_6] : memref<1x8x256xf32, #tpu.memory_space<vmem>>, vector<1x8x256xf32>
    %5 = vector.shape_cast %4 : vector<1x8x256xf32> to vector<8x256xf32>
    %6 = vector.shape_cast %3 : vector<8x256xf32> to vector<1x8x256xf32>
    tpu.vector_store %arg3[%c0_4, %c0_5, %c0_6], %6 {strides = array<i32>} : memref<1x8x256xf32, #tpu.memory_space<vmem>>, vector<1x8x256xf32>,
    %cst_7 = arith.constant dense<0.000000e+00> : vector<8xf32>
    %7 = vector.multi_reduction <add>, %3, %cst_7 [1] : vector<8x256xf32> to vector<8xf32>
    %8 = vector.shape_cast %7 : vector<8xf32> to vector<8x1xf32>
    %c0_8 = arith.constant 0 : index
    %c0_9 = arith.constant 0 : index
    %c0_10 = arith.constant 0 : index
    %9 = vector.load %arg4[%c0_8, %c0_9, %c0_10] : memref<1x8x1xf32, #tpu.memory_space<vmem>>, vector<1x8x1xf32>
    %10 = vector.shape_cast %9 : vector<1x8x1xf32> to vector<8x1xf32>
    %11 = vector.shape_cast %8 : vector<8x1xf32> to vector<1x8x1xf32>
    tpu.vector_store %arg4[%c0_8, %c0_9, %c0_10], %11 {strides = array<i32>} : memref<1x8x1xf32, #tpu.memory_space<vmem>>, vector<1x8x1xf32>,
    %12 = arith.mulf %3, %3 : vector<8x256xf32>
    %cst_11 = arith.constant dense<0.000000e+00> : vector<8xf32>
    %13 = vector.multi_reduction <add>, %12, %cst_11 [1] : vector<8x256xf32> to vector<8xf32>
    %14 = vector.shape_cast %13 : vector<8xf32> to vector<8x1xf32>
    %c0_12 = arith.constant 0 : index
    %c0_13 = arith.constant 0 : index
    %c0_14 = arith.constant 0 : index
    %15 = vector.load %arg5[%c0_12, %c0_13, %c0_14] : memref<1x8x1xf32, #tpu.memory_space<vmem>>, vector<1x8x1xf32>
    %16 = vector.shape_cast %15 : vector<1x8x1xf32> to vector<8x1xf32>
    %17 = vector.shape_cast %14 : vector<8x1xf32> to vector<1x8x1xf32>
    tpu.vector_store %arg5[%c0_12, %c0_13, %c0_14], %17 {strides = array<i32>} : memref<1x8x1xf32, #tpu.memory_space<vmem>>, vector<1x8x1xf32>,
    return
  }
  func.func @transform_0(%arg0: i32) -> (i32, i32) {
    %c0_i32 = arith.constant 0 : i32
    %c0_i32_0 = arith.constant 0 : i32
    %c0_i32_1 = arith.constant 0 : i32
    return %c0_i32, %c0_i32_0 : i32, i32
  }
  func.func @transform_1(%arg0: i32) -> (i32, i32, i32) {
    %c0_i32 = arith.constant 0 : i32
    %c0_i32_0 = arith.constant 0 : i32
    %c0_i32_1 = arith.constant 0 : i32
    return %arg0, %c0_i32, %c0_i32_0 : i32, i32, i32
  }
  func.func @transform_2(%arg0: i32) -> (i32, i32, i32) {
    %c0_i32 = arith.constant 0 : i32
    %c0_i32_0 = arith.constant 0 : i32
    %c0_i32_1 = arith.constant 0 : i32
    return %arg0, %c0_i32, %c0_i32_0 : i32, i32, i32
  }
  func.func @transform_3(%arg0: i32) -> (i32, i32, i32) {
    %c0_i32 = arith.constant 0 : i32
    %c0_i32_0 = arith.constant 0 : i32
    %c0_i32_1 = arith.constant 0 : i32
    return %arg0, %c0_i32, %c0_i32_0 : i32, i32, i32
  }
  func.func @transform_4(%arg0: i32) -> (i32, i32, i32) {
    %c0_i32 = arith.constant 0 : i32
    %c0_i32_0 = arith.constant 0 : i32
    %c0_i32_1 = arith.constant 0 : i32
    return %arg0, %c0_i32, %c0_i32_0 : i32, i32, i32
  }
}

</mosaic_0001>

<bundles_post_ra>
// kernel: tpu_custom_call.1
= control target key start
LH: loop header
LB: loop body
LE: loop exit
PB: predicated region body
PF: predicated region fallthrough
CT: control target
= control target key end

     0   :  { %10 = vsyncpa [#allocation3], 0  ;;  %s675_s0 = inlined_call_operand.vmem [shape: f32[8,36], index: 0, kind: input, shape index: {}]   ;;  %s676_s1 = inlined_call_operand.vmem [shape: f32[2,36,256], index: 1, kind: input, shape index: {}]   ;;  %s677_s2 = inlined_call_operand.hbm [shape: f32[2,8,256], index: 2, kind: output, shape index: {0}]   ;;  %s678_s3 = inlined_call_operand.vmem [shape: f32[2,8,1], index: 3, kind: output, shape index: {1}]   ;;  %s679_s4 = inlined_call_operand.vmem [shape: f32[2,8,1], index: 4, kind: output, shape index: {2}]  }
   0x1   :  { %12 = vsyncpa [#allocation3 + $0x1], 0  ;;  %s577_s15 = smov 0   ;;  %s579_s16 = smov 0  }
   0x2   :  { %s581_s17 = smov 0   ;;  %s583_s18 = smov 0  }
   0x3 LB: > { %s598_s19 = sadd.s32 4294967295, %s550_s18   ;;  %s430_s20 = sadd.s32 4294967294, %s550_s18   ;;  %s550_s18 = sphi %s583_s18, %s685_s18   ;;  %s546_s17 = sphi %s581_s17, %s684_s17   ;;  %s542_s16 = sphi %s579_s16, %s683_s16   ;;  %s538_s15 = sphi %s577_s15, %s682_s15  }
   0x4   : > { %s602_s21 = sadd.s32 1, %s550_s18   ;;  %s72_s22 = sadd.s32 1, %s546_s17 }
   0x5   : > { %s69_s23 = ssub.s32 %s550_s18, %s602_s21  ;;  %p82_p0 = scmp.ne.s32.totalorder %s546_s17, %s542_s16 }
   0x6   : > { %p70_p1 = scmp.eq.s32.totalorder %s69_s23, 0  ;;  %p83_p2 = scmp.eq.s32.totalorder %s598_s19, 1 }
   0x7   : > { %p88_p3 = scmp.ne.s32.totalorder %s542_s16, %s538_s15  ;;  %p89_p4 = scmp.eq.s32.totalorder %s430_s20, 1 }
   0x8   : > { %s613_s24 = scalar_select %p70_p1, %s546_s17, %s72_s22  }
   0x9   : > { %p615_p5 = por %p83_p2, %p82_p0  ;;  %p619_p6 = por %p89_p4, %p88_p3 }
   0xa   : > { %p433_p7 = scmp.ge.s32.totalorder %s550_s18, 1  ;;  %p170_p8 = scmp.lt.s32.totalorder %s550_s18, 3 }
   0xc   : > { %p171_p9 = pnand %p433_p7, %p170_p8 }
   0xd   : > { %p204_p10 = scmp.lt.s32.totalorder (!%p171_p9), %s598_s19, 1  ;;  %s189_s8 = sand.u32 (!%p171_p9), 1, %s542_s16  }
   0xe   : > { %174 = sbr.rel (%p171_p9) target bundleno = 287 (0x11f), region = 28  ;;  %s434_s9 = sshll.u32 (!%p171_p9), %s189_s8, 4 }
   0xf   : > { %s447_s10 = sshll.u32 (!%p171_p9), %s598_s19, 4  ;;  %s191_s14 = scalar_lea.vmem (!%p171_p9), [#allocation2], %s434_s9 }
  0x10   : > { %s312_s13 = scalar_lea.hbm (!%p171_p9), %s677_s2, %s447_s10  ;;  %s314_s20 = sshll.u32 (!%p171_p9), %s191_s14, 4  ;;  %s315_s20 = int_to_ptr.vmem [resolvable:$true] %s314_s20 }
  0x11   : > { %s316_s22 = sshll.u32 (!%p171_p9), %s312_s13, 4  ;;  %s293_s23 = scalar_lea.sflag (!%p171_p9), [#allocation3], %s189_s8  ;;  %s317_s22 = int_to_ptr.hbm [resolvable:$true] %s316_s22 }
  0x13   : > { %s627_s27 = scalar_select %p204_p10, %s598_s19, 1  ;;  %vm232_vm0 = vcmask 1043456   ;;  %v217_v10 = vld [vmem:[%s675_s0] sm:$0xff]  ;;  %vm228_vm1 = vcmask 293888  }
  0x15   : > { %s448_s28 = smul.u32 80, %s627_s27 }
  0x17   : > { %s208_s5 = scalar_lea.vmem %s676_s1, %s448_s28  ;;  %s502_s28 = sshra.s32 %s317_s22, 4  ;;  %s503_s28 = int_to_ptr.hbm [resolvable:$true] %s502_s28 }
  0x18   : > { %v226_v0 = vld [vmem:[%s208_s5 + $0x40] sm:$0xf]  ;;  %v227_v1 = vld [vmem:[%s208_s5 + $0x48] sm:$0xf]  ;;  %v224_v2 = vld [vmem:[%s208_s5 + $0x30] sm:$0xff]  ;;  %s504_s19 = scalar_lea.hbm %s503_s28, 16  ;;  %p509_p0 = scmp.lt.s32.totalorder %s503_s28, %s677_s2 }
  0x19   : > { %438 = vmatpush.msk.msra.mxu0 %vm232_vm0, %v226_v0  ;;  %440 = vmatpush.msk.msra.mxu1 %vm232_vm0, %v227_v1  ;;  %v225_v3 = vld [vmem:[%s208_s5 + $0x38] sm:$0xff]  ;;  %v222_v4 = vld [vmem:[%s208_s5 + $0x20] sm:$0xff]  ;;  %v223_v5 = vld [vmem:[%s208_s5 + $0x28] sm:$0xff]  ;;  %p505_p11 = scmp.ne.s32.totalorder %s503_s28, %s504_s19 }
  0x1a   : > { %v220_v6 = vld [vmem:[%s208_s5 + $0x10] sm:$0xff]  ;;  %v221_v7 = vld [vmem:[%s208_s5 + $0x18] sm:$0xff]  ;;  %v218_v8 = vld [vmem:[%s208_s5] sm:$0xff] }
  0x1b   : > { %251 = vmatpush.msra.mxu0 %v224_v2  ;;  %271 = vmatpush.msra.mxu1 %v225_v3  ;;  %v219_v9 = vld [vmem:[%s208_s5 + $0x8] sm:$0xff]  ;;  %p506_p12 = pnand %p505_p11, %p615_p5  ;;  %s508_s5 = scalar_lea.hbm %s677_s2, 32 }
  0x1c   : > { %p510_p1 = scmp.lt.s32.totalorder %s508_s5, %s504_s19 }
  0x1d   : > { %252 = vmatpush.msra.mxu0 %v222_v4  ;;  %272 = vmatpush.msra.mxu1 %v223_v5  ;;  %p507_p13 = pneg %p506_p12 }
  0x1e   : > { %p511_p2 = por %p510_p1, %p509_p0 }
  0x1f   : > { %253 = vmatpush.msra.mxu0 %v220_v6  ;;  %273 = vmatpush.msra.mxu1 %v221_v7 }
  0x20   : > { %p512_p3 = pnand %p511_p2, %p507_p13 }
  0x21   : > { %254 = vmatpush.msra.mxu0 %v218_v8  ;;  %274 = vmatpush.msra.mxu1 %v219_v9 }
  0x22   : > { %439 = vmatmul.msk.f32.vlgmr.msra.gmra.mxu0 %vm228_vm1, %v217_v10  ;;  %441 = vmatmul.msk.f32.vlgmr.msra.gmra.mxu1 %vm228_vm1, %v217_v10 }
  0x9f   : > { %v256_v11 = vpop.f32.mrf.mxu0  ;;  %v276_v12 = vpop.f32.mrf.mxu1 }
  0xa0   : > { %279 = vst [vmem:[%s191_s14] sm:$0xff] %v256_v11  ;;  %v281_v13 = vadd.f32 %v276_v12, %v256_v11 }
  0xa1   : > { %280 = vst [vmem:[%s191_s14 + $0x8] sm:$0xff] %v276_v12 }
  0xa2   : > { %282 = vadd.xlane.f32.xlu0 %v281_v13 }
  0xa3   : > { %515 = shalt.err (!%p512_p3)
}
  0xa4   : > { %449 = dma.vmem_to_hbm [thread:$0]  (%p615_p5), %s315_s20, 256, %s317_s22, %s293_s23   ;;  %v286_v14 = vmul.f32 %v256_v11, %v256_v11  ;;  %v287_v15 = vmul.f32 %v276_v12, %v276_v12  ;;  %vm284_vm2 = vcmask 7168  }
  0xa5   : > { %s436_s8 = sshll.u32 %s627_s27, 3 }
  0xa6   : > { %v288_v16 = vadd.f32 %v287_v15, %v286_v14  ;;  %s212_s11 = scalar_lea.vmem %s678_s3, %s436_s8  ;;  %s216_s14 = scalar_lea.vmem %s679_s4, %s436_s8 }
  0xaa   : > { %289 = vadd.xlane.f32.xlu0 %v288_v16 }
 0x115   : > { %v283_v17 = vpop.xlane.xlu0 %282 }
 0x116   : > { %285 = vst.msk [vmem:[%s212_s11] sm:$0xff] %vm284_vm2, %v283_v17 }
 0x11d   : > { %v290_v18 = vpop.xlane.xlu0 %289 }
 0x11e   : > { %291 = vst.msk [vmem:[%s216_s14] sm:$0xff] %vm284_vm2, %v290_v18 }
 0x11f PF: > { %p455_p4 = scmp.ge.s32.totalorder %s550_s18, 2  ;;  %s334_s25 = sand.u32 1, %s538_s15  }
 0x120   : > { %s335_s27 = scalar_lea.sflag [#allocation3], %s334_s25 }
 0x121   : > { %p452_p5 = pnand %p455_p4, %p619_p6 }
 0x123   : > { %p453_p7 = pneg %p452_p5 }
 0x125   : > { %533 = dma.done.wait (%p453_p7), %s335_s27, 256  }
 0x126   : > { %535 = vsyncadd (%p453_p7), %s335_s27, 4294967040  ;;  %p15_p8 = scmp.ge.s32.totalorder %s602_s21, 4   ;;  %s682_s15 = smov %s542_s16 }
 0x127   : > { %s683_s16 = smov %s546_s17  ;;  %s684_s17 = smov %s613_s24 }
 0x128   : > { %s685_s18 = smov %s602_s21  ;;  %17 = sbr.rel (!%p15_p8) target bundleno = 3 (0x3), region = 87 }
 0x12d   :  { %355 = vsyncpa [#allocation3], 1 }
 0x12e   :  { %357 = vsyncpa [#allocation3 + $0x1], 1 }

</bundles_post_ra>
